<compile_context>
chip_gen: v7x
topology: tpu7x:2x2x1
jax: 0.10.0
libtpu: 0.0.40
codegen_flags: <defaults>
</compile_context>

<pallas_src>
import jax
import jax.numpy as jnp
from jax.experimental import pallas as pl
from jax.experimental.pallas import tpu as pltpu

_W = 512               # lane-dense last dim (multiple of 128)
_MAX_BLOCK_ROWS = 512  # 512 x 512 f32 = 1 MiB per f32 operand block
_MIN_BLOCK_ROWS = 32   # int8 minimum tile is (32, 128)


def _soft_round_kernel(x_ref, mask_ref, o_ref):
    x = x_ref[...]
    m = mask_ref[...]
    # Single select: rounded value where the mask marks a binary variable, else passthrough.
    o_ref[...] = jnp.where(m != 0, jnp.round(x), x)


def soft_rounding(x_lp: jax.Array, binary_idxs: jax.Array) -> jax.Array:
    """Forward pass of SoftRounding: round entries at binary_idxs, pass through the rest."""
    x_lp = jnp.asarray(x_lp, jnp.float32)
    n = x_lp.shape[0]

    # Choose tiling: big blocks for large N, one small (still >= (32,512)) block otherwise.
    rows = pl.cdiv(n, _W)
    if rows <= _MAX_BLOCK_ROWS:
        block_rows = ((rows + _MIN_BLOCK_ROWS - 1) // _MIN_BLOCK_ROWS) * _MIN_BLOCK_ROWS
    else:
        block_rows = _MAX_BLOCK_ROWS
    rows_pad = ((rows + block_rows - 1) // block_rows) * block_rows
    n_pad = rows_pad * _W

    # Dense int8 mask built directly at padded length (avoids a separate pad pass).
    idx = jnp.asarray(binary_idxs, jnp.int32)
    mask = jnp.zeros((n_pad,), jnp.int8).at[idx].set(1)

    # Pad x only if needed, then reshape both to lane-dense 2-D.
    x_p = x_lp if n_pad == n else jnp.pad(x_lp, (0, n_pad - n))
    x2 = x_p.reshape(rows_pad, _W)
    m2 = mask.reshape(rows_pad, _W)

    grid = (rows_pad // block_rows,)
    spec = pl.BlockSpec((block_rows, _W), lambda i: (i, 0))

    out2 = pl.pallas_call(
        _soft_round_kernel,
        out_shape=jax.ShapeDtypeStruct((rows_pad, _W), jnp.float32),
        grid_spec=pltpu.PrefetchScalarGridSpec(
            num_scalar_prefetch=0,
            grid=grid,
            in_specs=[spec, spec],
            out_specs=spec,
        ),
        compiler_params=pltpu.CompilerParams(
            dimension_semantics=("parallel",),
        ),
    )(x2, m2)

    out = out2.reshape(n_pad)
    return out if n_pad == n else out[:n]


if __name__ == "__main__":
    key = jax.random.PRNGKey(0)
    n = 1024  # small LP vector
    # LP relaxation values, deliberately a bit outside [0, 1] to exercise true rounding.
    x_lp = jax.random.uniform(key, (n,), dtype=jnp.float32) * 2.0 - 0.5
    # Mark every other variable as a binary variable.
    binary_idxs = jnp.arange(0, n, 2, dtype=jnp.int32)

    out = soft_rounding(x_lp, binary_idxs)
    out = jax.block_until_ready(out)

    # Pure-JAX reference for correctness.
    mask = jnp.zeros((n,), jnp.int8).at[binary_idxs].set(1)
    ref = jnp.where(mask != 0, jnp.round(x_lp), x_lp)

    assert out.shape == x_lp.shape
    assert jnp.allclose(out, ref, atol=0.0, rtol=0.0), "mismatch vs reference"
    print("KERNEL_OK")
</pallas_src>

<mosaic_0001>
module attributes {stable_mosaic.version = 11 : i64} {
  func.func @_soft_round_kernel(%arg0: i32, %arg1: memref<32x512xf32, #tpu.memory_space<vmem>>, %arg2: memref<32x512xi8, #tpu.memory_space<vmem>>, %arg3: memref<32x512xf32, #tpu.memory_space<vmem>>) attributes {dimension_semantics = [#tpu.dimension_semantics<parallel>], iteration_bounds = array<i64: 1>, scalar_prefetch = 0 : i64, scratch_operands = 0 : i64, tpu.core_type = #tpu.core_type<tc>, window_params = [{transform_indices = @transform_0, window_bounds = array<i64: 32, 512>}, {transform_indices = @transform_1, window_bounds = array<i64: 32, 512>}, {transform_indices = @transform_2, window_bounds = array<i64: 32, 512>}]} {
    %c0 = arith.constant 0 : index
    %c0_0 = arith.constant 0 : index
    %0 = vector.load %arg1[%c0, %c0_0] : memref<32x512xf32, #tpu.memory_space<vmem>>, vector<32x512xf32>
    %c0_1 = arith.constant 0 : index
    %c0_2 = arith.constant 0 : index
    %1 = vector.load %arg2[%c0_1, %c0_2] : memref<32x512xi8, #tpu.memory_space<vmem>>, vector<32x512xi8>
    %c0_i8 = arith.constant 0 : i8
    %2 = vector.broadcast %c0_i8 : i8 to vector<32x512xi8>
    %3 = arith.cmpi ne, %1, %2 : vector<32x512xi8>
    %4 = math.roundeven %0 : vector<32x512xf32>
    %5 = arith.select %3, %4, %0 : vector<32x512xi1>, vector<32x512xf32>
    %c0_3 = arith.constant 0 : index
    %c0_4 = arith.constant 0 : index
    %6 = vector.load %arg3[%c0_3, %c0_4] : memref<32x512xf32, #tpu.memory_space<vmem>>, vector<32x512xf32>
    tpu.vector_store %arg3[%c0_3, %c0_4], %5 {strides = array<i32>} : memref<32x512xf32, #tpu.memory_space<vmem>>, vector<32x512xf32>,
    return
  }
  func.func @transform_0(%arg0: i32) -> (i32, i32) {
    %c0_i32 = arith.constant 0 : i32
    %c0_i32_0 = arith.constant 0 : i32
    return %arg0, %c0_i32 : i32, i32
  }
  func.func @transform_1(%arg0: i32) -> (i32, i32) {
    %c0_i32 = arith.constant 0 : i32
    %c0_i32_0 = arith.constant 0 : i32
    return %arg0, %c0_i32 : i32, i32
  }
  func.func @transform_2(%arg0: i32) -> (i32, i32) {
    %c0_i32 = arith.constant 0 : i32
    %c0_i32_0 = arith.constant 0 : i32
    return %arg0, %c0_i32 : i32, i32
  }
}

</mosaic_0001>

<bundles_post_ra>
// kernel: tpu_custom_call.1
= control target key start
LH: loop header
LB: loop body
LE: loop exit
PB: predicated region body
PF: predicated region fallthrough
CT: control target
= control target key end

     0   :  { %7 = vsyncpa [#allocation3], 0  ;;  %s433_s0 = inlined_call_operand.hbm [shape: f32[32,512], index: 0, kind: input, shape index: {}]   ;;  %s434_s1 = inlined_call_operand.hbm [shape: s8[32,512], index: 1, kind: input, shape index: {}]   ;;  %s435_s2 = inlined_call_operand.hbm [shape: f32[32,512], index: 2, kind: output, shape index: {}]  }
   0x1   :  { %8 = vsyncpa [#allocation6], 0 }
   0x2   :  { %9 = vsyncpa [#allocation4], 0  ;;  %s296_s9 = smov [#allocation2]   ;;  %s224_s13 = scalar_lea.hbm %s433_s0, 2048 }
   0x3   :  { %s15_s10 = sshll.u32 %s296_s9, 4  ;;  %p225_p0 = scmp.ne.s32.totalorder %s433_s0, %s224_s13  ;;  %s16_s10 = int_to_ptr.vmem [resolvable:$true] %s15_s10 }
   0x4   :  { %p228_p1 = scmp.lt.u32.totalorder %s224_s13, %s433_s0 }
   0x6   :  { %p230_p2 = pnand %p228_p1, %p225_p0 }
   0x8   :  { %233 = shalt.err (!%p230_p2)
}
   0x9   :  { %s234_s18 = scalar_lea.vmem %s16_s10, 2048  ;;  %p239_p4 = scmp.lt.s32.totalorder %s16_s10, %s16_s10 }
   0xa   :  { %p235_p3 = scmp.ne.s32.totalorder %s16_s10, %s234_s18  ;;  %p240_p5 = scmp.lt.s32.totalorder %s234_s18, %s234_s18 }
   0xc   :  { %p241_p6 = por %p240_p5, %p239_p4 }
   0xe   :  { %p242_p7 = pnand %p241_p6, %p235_p3 }
  0x10   :  { %245 = shalt.err (!%p242_p7)
}
  0x11   :  { %s297_s19 = smov 512   ;;  %s298_s20 = smov 32  }
  0x12   :  { %21 = dma.hbm_to_vmem [thread:$0]  %s433_s0, 2048, %s16_s10, [#allocation3], %s297_s19, %s297_s19, %s298_s20  }
  0x13   :  { %s299_s23 = smov [#allocation5]   ;;  %s246_s27 = scalar_lea.hbm %s434_s1, 512 }
  0x14   :  { %s28_s24 = sshll.u32 %s299_s23, 4  ;;  %p247_p8 = scmp.ne.s32.totalorder %s434_s1, %s246_s27  ;;  %s29_s24 = int_to_ptr.vmem [resolvable:$true] %s28_s24 }
  0x15   :  { %p250_p9 = scmp.lt.u32.totalorder %s246_s27, %s434_s1 }
  0x17   :  { %p252_p10 = pnand %p250_p9, %p247_p8 }
  0x19   :  { %255 = shalt.err (!%p252_p10)
}
  0x1a   :  { %s256_s4 = scalar_lea.vmem %s29_s24, 512  ;;  %p261_p12 = scmp.lt.s32.totalorder %s29_s24, %s29_s24 }
  0x1b   :  { %p257_p11 = scmp.ne.s32.totalorder %s29_s24, %s256_s4  ;;  %p262_p13 = scmp.lt.s32.totalorder %s256_s4, %s256_s4 }
  0x1d   :  { %p263_p0 = por %p262_p13, %p261_p12 }
  0x1f   :  { %p264_p1 = pnand %p263_p0, %p257_p11 }
  0x21   :  { %267 = shalt.err (!%p264_p1)
}
  0x22   :  { %31 = dma.hbm_to_vmem [thread:$0]  %s434_s1, 512, %s29_s24, [#allocation6]  }
  0x23   :  { %290 = dma.done.wait [#allocation3], 2048  }
  0x24   :  { %291 = vsyncadd [#allocation3], 4294965248 }
  0x25   :  { %292 = dma.done.wait [#allocation6], 512  }
  0x26   :  { %293 = vsyncadd [#allocation6], 4294966784  ;;  %v56_v0 = vld [vmem:[#allocation5] sm:$0xff]  ;;  %v57_v1 = vld [vmem:[#allocation5 + $0x8] sm:$0xff]  ;;  %v300_v5 = vmov 0   ;;  %s301_s1 = smov [#allocation7]  }
  0x27   :  { %v344_v2 = vld [vmem:[#allocation2] sm:$0xff]  ;;  %v58_v3 = vld [vmem:[#allocation5 + $0x10] sm:$0xff]  ;;  %v59_v4 = vld [vmem:[#allocation5 + $0x18] sm:$0xff]  ;;  %vm60_vm0 = vnez %v56_v0  ;;  %vm61_vm1 = vnez %v57_v1  ;;  %s189_s6 = sshll.u32 %s301_s1, 4  ;;  %s190_s6 = int_to_ptr.vmem [resolvable:$true] %s189_s6 }
  0x28   :  { %vm62_vm2 = vnez %v58_v3  ;;  %vm63_vm3 = vnez %v59_v4  ;;  %v347_v6 = vsel %vm60_vm0, 16843009, %v300_v5  ;;  %v350_v7 = vsel %vm61_vm1, 16843009, %v300_v5  ;;  %v41_v8 = vld [vmem:[#allocation2 + $0x8] sm:$0xff]  ;;  %v42_v9 = vld [vmem:[#allocation2 + $0x10] sm:$0xff]  ;;  %p273_p3 = scmp.lt.s32.totalorder %s190_s6, %s190_s6 }
  0x29   :  { %v353_v10 = vsel %vm62_vm2, 16843009, %v300_v5  ;;  %v356_v11 = vsel %vm63_vm3, 16843009, %v300_v5  ;;  %v84_v12 = vunpack.c.0.s8 %v347_v6  ;;  %v85_v13 = vunpack.c.0.s8 %v350_v7  ;;  %v43_v14 = vld [vmem:[#allocation2 + $0x18] sm:$0xff]  ;;  %v363_v18 = vld [vmem:[#allocation2 + $0x20] sm:$0xff] }
  0x2a   :  { %v202_v15 = vround.rtne.f32 %v344_v2  ;;  %v86_v16 = vunpack.c.0.s8 %v353_v10  ;;  %v87_v17 = vunpack.c.0.s8 %v356_v11  ;;  %v365_v19 = vld [vmem:[#allocation2 + $0x28] sm:$0xff]  ;;  %v367_v20 = vld [vmem:[#allocation2 + $0x30] sm:$0xff]  ;;  %v203_v22 = vround.rtne.f32 %v41_v8  ;;  %v373_v29 = vld [vmem:[#allocation2 + $0x38] sm:$0xff]  ;;  %s268_s7 = scalar_lea.vmem %s190_s6, 2048 }
  0x2b   :  { %v100_v21 = vpack.c.b16 %v85_v13, %v84_v12  ;;  %v204_v23 = vround.rtne.f32 %v42_v9  ;;  %v88_v24 = vunpack.c.1.s8 %v347_v6  ;;  %v89_v26 = vunpack.c.1.s8 %v350_v7  ;;  %v378_v34 = vld [vmem:[#allocation2 + $0x40] sm:$0xff]  ;;  %v380_v35 = vld [vmem:[#allocation2 + $0x48] sm:$0xff]  ;;  %v383_v40 = vld [vmem:[#allocation2 + $0x50] sm:$0xff]  ;;  %p269_p2 = scmp.ne.s32.totalorder %s190_s6, %s268_s7  ;;  %p274_p4 = scmp.lt.s32.totalorder %s268_s7, %s268_s7 }
  0x2c   :  { %v101_v25 = vpack.c.b16 %v87_v17, %v86_v16  ;;  %v90_v27 = vunpack.c.1.s8 %v353_v10  ;;  %v91_v28 = vunpack.c.1.s8 %v356_v11  ;;  %v205_v30 = vround.rtne.f32 %v43_v14  ;;  %v51_v0 = vld [vmem:[#allocation2 + $0x58] sm:$0xff] }
  0x2d   :  { %v206_v31 = vround.rtne.f32 %v363_v18  ;;  %v207_v32 = vround.rtne.f32 %v365_v19  ;;  %v208_v33 = vround.rtne.f32 %v367_v20  ;;  %v103_v37 = vpack.c.b16 %v89_v26, %v88_v24  ;;  %v52_v24 = vld [vmem:[#allocation2 + $0x60] sm:$0xff]  ;;  %v53_v26 = vld [vmem:[#allocation2 + $0x68] sm:$0xff]  ;;  %p275_p5 = por %p274_p4, %p273_p3 }
  0x2e   :  { %v102_v36 = vpack.c.b8 %v101_v25, %v100_v21  ;;  %v104_v38 = vpack.c.b16 %v91_v28, %v90_v27  ;;  %v92_v39 = vunpack.c.2.s8 %v347_v6  ;;  %v209_v41 = vround.rtne.f32 %v373_v29 }
  0x2f   :  { %v93_v42 = vunpack.c.2.s8 %v350_v7  ;;  %v94_v43 = vunpack.c.2.s8 %v353_v10  ;;  %v95_v44 = vunpack.c.2.s8 %v356_v11  ;;  %v210_v46 = vround.rtne.f32 %v378_v34  ;;  %p276_p6 = pnand %p275_p5, %p269_p2 }
  0x30   :  { %vm112_vm4 = vnez %v102_v36  ;;  %v105_v45 = vpack.c.b8 %v104_v38, %v103_v37  ;;  %v211_v47 = vround.rtne.f32 %v380_v35  ;;  %v212_v51 = vround.rtne.f32 %v383_v40 }
  0x31   :  { %v116_v48 = vsel %vm112_vm4, 16843009, %v300_v5  ;;  %v106_v49 = vpack.c.b16 %v93_v42, %v92_v39  ;;  %v107_v50 = vpack.c.b16 %v95_v44, %v94_v43  ;;  %v96_v58 = vunpack.c.3.s8 %v347_v6 }
  0x32   :  { %v120_v52 = vunpack.c.0.s8 %v116_v48  ;;  %v121_v53 = vunpack.c.1.s8 %v116_v48  ;;  %v122_v54 = vunpack.c.2.s8 %v116_v48  ;;  %v123_v55 = vunpack.c.3.s8 %v116_v48 }
  0x33   :  { %vm393_vm5 = vnez %v105_v45  ;;  %v108_v57 = vpack.c.b8 %v107_v50, %v106_v49  ;;  %v97_v59 = vunpack.c.3.s8 %v350_v7  ;;  %v98_v3 = vunpack.c.3.s8 %v353_v10 }
  0x34   :  { %vm136_vm6 = vcmp.ne.s32.totalorder %v120_v52, 0  ;;  %vm137_vm7 = vcmp.ne.s32.totalorder %v121_v53, 0  ;;  %vm138_vm8 = vcmp.ne.s32.totalorder %v122_v54, 0  ;;  %vm139_vm9 = vcmp.ne.s32.totalorder %v123_v55, 0 }
  0x35   :  { %v152_v60 = vsel %vm136_vm6, %v202_v15, %v344_v2  ;;  %v153_v61 = vsel %vm137_vm7, %v203_v22, %v41_v8  ;;  %v154_v62 = vsel %vm138_vm8, %v204_v23, %v42_v9  ;;  %v155_v63 = vsel %vm139_vm9, %v205_v30, %v43_v14 }
  0x36   :  { %168 = vst [vmem:[#allocation7] sm:$0xff] %v152_v60  ;;  %169 = vst [vmem:[#allocation7 + $0x8] sm:$0xff] %v153_v61  ;;  %v117_v1 = vsel %vm393_vm5, 16843009, %v300_v5  ;;  %vm114_vm10 = vnez %v108_v57  ;;  %v99_v4 = vunpack.c.3.s8 %v356_v11  ;;  %v213_v12 = vround.rtne.f32 %v51_v0 }
  0x37   :  { %170 = vst [vmem:[#allocation7 + $0x10] sm:$0xff] %v154_v62  ;;  %171 = vst [vmem:[#allocation7 + $0x18] sm:$0xff] %v155_v63  ;;  %v124_v6 = vunpack.c.0.s8 %v117_v1  ;;  %v125_v7 = vunpack.c.1.s8 %v117_v1  ;;  %v126_v2 = vunpack.c.2.s8 %v117_v1  ;;  %v127_v8 = vunpack.c.3.s8 %v117_v1 }
  0x38   :  { %v118_v9 = vsel %vm114_vm10, 16843009, %v300_v5  ;;  %v109_v13 = vpack.c.b16 %v97_v59, %v96_v58  ;;  %v110_v14 = vpack.c.b16 %v99_v4, %v98_v3  ;;  %v214_v30 = vround.rtne.f32 %v52_v24 }
  0x39   :  { %vm140_vm11 = vcmp.ne.s32.totalorder %v124_v6, 0  ;;  %vm141_vm12 = vcmp.ne.s32.totalorder %v125_v7, 0  ;;  %vm142_vm13 = vcmp.ne.s32.totalorder %v126_v2, 0  ;;  %vm143_vm14 = vcmp.ne.s32.totalorder %v127_v8, 0 }
  0x3a   :  { %v156_v15 = vsel %vm140_vm11, %v206_v31, %v363_v18  ;;  %v157_v16 = vsel %vm141_vm12, %v207_v32, %v365_v19  ;;  %v158_v10 = vsel %vm142_vm13, %v208_v33, %v367_v20  ;;  %v159_v11 = vsel %vm143_vm14, %v209_v41, %v373_v29  ;;  %v54_v18 = vld [vmem:[#allocation2 + $0x70] sm:$0xff]  ;;  %v55_v19 = vld [vmem:[#allocation2 + $0x78] sm:$0xff] }
  0x3b   :  { %172 = vst [vmem:[#allocation7 + $0x20] sm:$0xff] %v156_v15  ;;  %173 = vst [vmem:[#allocation7 + $0x28] sm:$0xff] %v157_v16  ;;  %v128_v17 = vunpack.c.0.s8 %v118_v9  ;;  %v129_v21 = vunpack.c.1.s8 %v118_v9  ;;  %v130_v22 = vunpack.c.2.s8 %v118_v9  ;;  %v131_v23 = vunpack.c.3.s8 %v118_v9 }
  0x3c   :  { %174 = vst [vmem:[#allocation7 + $0x30] sm:$0xff] %v158_v10  ;;  %175 = vst [vmem:[#allocation7 + $0x38] sm:$0xff] %v159_v11  ;;  %v111_v25 = vpack.c.b8 %v110_v14, %v109_v13  ;;  %v215_v32 = vround.rtne.f32 %v53_v26  ;;  %v216_v33 = vround.rtne.f32 %v54_v18  ;;  %v217_v36 = vround.rtne.f32 %v55_v19 }
  0x3d   :  { %vm144_vm15 = vcmp.ne.s32.totalorder %v128_v17, 0  ;;  %vm145_vm0 = vcmp.ne.s32.totalorder %v129_v21, 0  ;;  %vm146_vm1 = vcmp.ne.s32.totalorder %v130_v22, 0  ;;  %vm147_vm2 = vcmp.ne.s32.totalorder %v131_v23, 0 }
  0x3e   :  { %v160_v20 = vsel %vm144_vm15, %v210_v46, %v378_v34  ;;  %v161_v27 = vsel %vm145_vm0, %v211_v47, %v380_v35  ;;  %v162_v28 = vsel %vm146_vm1, %v212_v51, %v383_v40  ;;  %v163_v29 = vsel %vm147_vm2, %v213_v12, %v51_v0 }
  0x3f   :  { %176 = vst [vmem:[#allocation7 + $0x40] sm:$0xff] %v160_v20  ;;  %177 = vst [vmem:[#allocation7 + $0x48] sm:$0xff] %v161_v27  ;;  %vm115_vm3 = vnez %v111_v25 }
  0x40   :  { %178 = vst [vmem:[#allocation7 + $0x50] sm:$0xff] %v162_v28  ;;  %179 = vst [vmem:[#allocation7 + $0x58] sm:$0xff] %v163_v29  ;;  %v119_v31 = vsel %vm115_vm3, 16843009, %v300_v5 }
  0x41   :  { %v132_v34 = vunpack.c.0.s8 %v119_v31  ;;  %v133_v37 = vunpack.c.1.s8 %v119_v31  ;;  %v134_v38 = vunpack.c.2.s8 %v119_v31  ;;  %v135_v35 = vunpack.c.3.s8 %v119_v31 }
  0x43   :  { %vm148_vm4 = vcmp.ne.s32.totalorder %v132_v34, 0  ;;  %vm149_vm5 = vcmp.ne.s32.totalorder %v133_v37, 0  ;;  %vm150_vm6 = vcmp.ne.s32.totalorder %v134_v38, 0  ;;  %vm151_vm7 = vcmp.ne.s32.totalorder %v135_v35, 0 }
  0x44   :  { %v164_v39 = vsel %vm148_vm4, %v214_v30, %v52_v24  ;;  %v165_v40 = vsel %vm149_vm5, %v215_v32, %v53_v26  ;;  %v166_v41 = vsel %vm150_vm6, %v216_v33, %v54_v18  ;;  %v167_v42 = vsel %vm151_vm7, %v217_v36, %v55_v19 }
  0x45   :  { %180 = vst [vmem:[#allocation7 + $0x60] sm:$0xff] %v164_v39  ;;  %181 = vst [vmem:[#allocation7 + $0x68] sm:$0xff] %v165_v40 }
  0x46   :  { %182 = vst [vmem:[#allocation7 + $0x70] sm:$0xff] %v166_v41  ;;  %183 = vst [vmem:[#allocation7 + $0x78] sm:$0xff] %v167_v42 }
  0x47   :  { %279 = shalt.err (!%p276_p6)
}
  0x48   :  { %s280_s10 = scalar_lea.hbm %s435_s2, 2048 }
  0x49   :  { %p281_p7 = scmp.ne.s32.totalorder %s435_s2, %s280_s10  ;;  %p284_p8 = scmp.lt.u32.totalorder %s280_s10, %s435_s2 }
  0x4b   :  { %p286_p9 = pnand %p284_p8, %p281_p7 }
  0x4d   :  { %289 = shalt.err (!%p286_p9)
}
  0x4e   :  { %195 = dma.vmem_to_hbm [thread:$0]  %s190_s6, 2048, %s435_s2, [#allocation4], %s297_s19, %s297_s19, %s298_s20  }
  0x4f   :  { %294 = dma.done.wait [#allocation4], 2048  }
  0x50   :  { %295 = vsyncadd [#allocation4], 4294965248 }
  0x51   :  { %199 = vsyncpa [#allocation3], 1 }
  0x52   :  { %200 = vsyncpa [#allocation6], 1 }
  0x53   :  { %201 = vsyncpa [#allocation4], 1 }

</bundles_post_ra>
